<compile_context>
chip_gen: v7x
topology: tpu7x:2x2x1
jax: 0.10.0
libtpu: 0.0.40
codegen_flags: <defaults>
</compile_context>

<pallas_src>
import jax
import jax.numpy as jnp
from jax.experimental import pallas as pl
from jax.experimental.pallas import tpu as pltpu


def _round_up(x, m):
    return (x + m - 1) // m * m


def _mlp_kernel(x_ref, w1_ref, b1_ref, w2_ref, b2_ref, w3_ref, b3_ref, o_ref):
    x = x_ref[...]                                   # (TILE_B, input_dim) bf16
    # fc1 + bias + ReLU (accumulate in f32)
    h1 = jnp.dot(x, w1_ref[...], preferred_element_type=jnp.float32) + b1_ref[...]
    h1 = jnp.maximum(h1, 0.0)
    # dropout (eval mode) -> identity
    # fc2 + bias + ReLU
    h2 = jnp.dot(h1.astype(w2_ref.dtype), w2_ref[...],
                 preferred_element_type=jnp.float32) + b2_ref[...]
    h2 = jnp.maximum(h2, 0.0)
    # dropout (eval mode) -> identity
    # fc3 (logits, no activation)
    o_ref[...] = (jnp.dot(h2.astype(w3_ref.dtype), w3_ref[...],
                          preferred_element_type=jnp.float32)
                  + b3_ref[...]).astype(o_ref.dtype)


def simple_traffic_model(x, params, *, tile_b=512, compute_dtype=jnp.bfloat16):
    """Fused forward pass of SimpleTrafficModel.

    x: (B, input_dim) float32. Weights are (in, out); biases (1, out).
    Returns (B, num_classes) float32 logits.
    """
    w1, b1, w2, b2, w3, b3 = params
    B, input_dim = x.shape
    hidden_dim = w1.shape[1]
    num_classes = w3.shape[1]

    # --- pad hidden dim to a multiple of the 128-lane width (exact: ReLU(0)=0) ---
    Hp = _round_up(hidden_dim, 128)
    ph = Hp - hidden_dim
    w1p = jnp.pad(w1, ((0, 0), (0, ph))).astype(compute_dtype)   # (input_dim, Hp)
    b1p = jnp.pad(b1, ((0, 0), (0, ph))).astype(jnp.float32)     # (1, Hp)
    w2p = jnp.pad(w2, ((0, ph), (0, ph))).astype(compute_dtype)  # (Hp, Hp)
    b2p = jnp.pad(b2, ((0, 0), (0, ph))).astype(jnp.float32)     # (1, Hp)
    w3p = jnp.pad(w3, ((0, ph), (0, 0))).astype(compute_dtype)   # (Hp, num_classes)
    b3p = b3.astype(jnp.float32)                                 # (1, num_classes)

    # --- batch tiling (grid over batch, double-buffered by BlockSpec) ---
    tile_b = max(8, min(tile_b, _round_up(B, 8)))
    Bp = _round_up(B, tile_b)
    xc = x.astype(compute_dtype)
    if Bp != B:
        xc = jnp.pad(xc, ((0, Bp - B), (0, 0)))
    grid = (Bp // tile_b,)

    in_specs = [
        pl.BlockSpec((tile_b, input_dim), lambda i: (i, 0)),     # x: streamed over batch
        pl.BlockSpec((input_dim, Hp), lambda i: (0, 0)),         # W1 (resident)
        pl.BlockSpec((1, Hp), lambda i: (0, 0)),                 # b1
        pl.BlockSpec((Hp, Hp), lambda i: (0, 0)),                # W2
        pl.BlockSpec((1, Hp), lambda i: (0, 0)),                 # b2
        pl.BlockSpec((Hp, num_classes), lambda i: (0, 0)),       # W3
        pl.BlockSpec((1, num_classes), lambda i: (0, 0)),        # b3
    ]
    out_specs = pl.BlockSpec((tile_b, num_classes), lambda i: (i, 0))

    itemsize = jnp.dtype(compute_dtype).itemsize
    weight_bytes = sum(int(a.size) * jnp.dtype(a.dtype).itemsize
                       for a in (w1p, b1p, w2p, b2p, w3p, b3p))
    cost = pl.CostEstimate(
        flops=2 * Bp * (input_dim * Hp + Hp * Hp + Hp * num_classes),
        transcendentals=0,
        bytes_accessed=Bp * input_dim * itemsize + Bp * num_classes * 4 + weight_bytes,
    )

    out = pl.pallas_call(
        _mlp_kernel,
        out_shape=jax.ShapeDtypeStruct((Bp, num_classes), jnp.float32),
        grid=grid,
        in_specs=in_specs,
        out_specs=out_specs,
        compiler_params=pltpu.CompilerParams(
            dimension_semantics=("parallel",)),
        cost_estimate=cost,
    )(xc, w1p, b1p, w2p, b2p, w3p, b3p)

    return out[:B]


def init_params(key, input_dim=10, hidden_dim=20, num_classes=2):
    """Deterministic init mimicking torch.nn.Linear default (U(-1/sqrt(fan_in), 1/sqrt(fan_in)))."""
    ks = jax.random.split(key, 6)

    def linear(kw, kb, fan_in, fan_out):
        bound = 1.0 / jnp.sqrt(jnp.float32(fan_in))
        w = jax.random.uniform(kw, (fan_in, fan_out), jnp.float32, -bound, bound)
        b = jax.random.uniform(kb, (1, fan_out), jnp.float32, -bound, bound)
        return w, b

    w1, b1 = linear(ks[0], ks[1], input_dim, hidden_dim)
    w2, b2 = linear(ks[2], ks[3], hidden_dim, hidden_dim)
    w3, b3 = linear(ks[4], ks[5], hidden_dim, num_classes)
    return (w1, b1, w2, b2, w3, b3)


def reference_forward(x, params, compute_dtype=jnp.bfloat16):
    """Pure-JAX reference emulating the kernel's bf16-input / f32-accumulate numerics."""
    w1, b1, w2, b2, w3, b3 = params
    f = lambda a: a.astype(compute_dtype).astype(jnp.float32)
    h1 = jnp.maximum(f(x) @ f(w1) + b1, 0.0)
    h2 = jnp.maximum(f(h1) @ f(w2) + b2, 0.0)
    return f(h2) @ f(w3) + b3


if __name__ == "__main__":
    key = jax.random.PRNGKey(0)
    k_x, k_p = jax.random.split(key)

    input_dim, hidden_dim, num_classes = 10, 20, 2
    batch = 8

    x = jax.random.normal(k_x, (batch, input_dim), dtype=jnp.float32)
    params = init_params(k_p, input_dim, hidden_dim, num_classes)

    out = simple_traffic_model(x, params)
    out = jax.block_until_ready(out)

    ref = reference_forward(x, params)
    assert out.shape == (batch, num_classes)
    assert jnp.allclose(out, ref, atol=1e-2, rtol=1e-2), "mismatch vs reference"

    print("KERNEL_OK")
</pallas_src>

<mosaic_0001>
module attributes {stable_mosaic.version = 11 : i64} {
  func.func @_mlp_kernel(%arg0: i32, %arg1: memref<8x10xbf16, #tpu.memory_space<vmem>>, %arg2: memref<10x128xbf16, #tpu.memory_space<vmem>>, %arg3: memref<1x128xf32, #tpu.memory_space<vmem>>, %arg4: memref<128x128xbf16, #tpu.memory_space<vmem>>, %arg5: memref<1x128xf32, #tpu.memory_space<vmem>>, %arg6: memref<128x2xbf16, #tpu.memory_space<vmem>>, %arg7: memref<1x2xf32, #tpu.memory_space<vmem>>, %arg8: memref<8x2xf32, #tpu.memory_space<vmem>>) attributes {dimension_semantics = [#tpu.dimension_semantics<parallel>], iteration_bounds = array<i64: 1>, scalar_prefetch = 0 : i64, scratch_operands = 0 : i64, tpu.core_type = #tpu.core_type<tc>, window_params = [{transform_indices = @transform_0, window_bounds = array<i64: 8, 10>}, {pipeline_mode = #tpu.pipeline_mode<synchronous>, transform_indices = @transform_1, window_bounds = array<i64: 10, 128>}, {pipeline_mode = #tpu.pipeline_mode<synchronous>, transform_indices = @transform_2, window_bounds = array<i64: 1, 128>}, {pipeline_mode = #tpu.pipeline_mode<synchronous>, transform_indices = @transform_3, window_bounds = array<i64: 128, 128>}, {pipeline_mode = #tpu.pipeline_mode<synchronous>, transform_indices = @transform_4, window_bounds = array<i64: 1, 128>}, {pipeline_mode = #tpu.pipeline_mode<synchronous>, transform_indices = @transform_5, window_bounds = array<i64: 128, 2>}, {pipeline_mode = #tpu.pipeline_mode<synchronous>, transform_indices = @transform_6, window_bounds = array<i64: 1, 2>}, {transform_indices = @transform_7, window_bounds = array<i64: 8, 2>}]} {
    %c0 = arith.constant 0 : index
    %c0_0 = arith.constant 0 : index
    %0 = vector.load %arg1[%c0, %c0_0] : memref<8x10xbf16, #tpu.memory_space<vmem>>, vector<8x10xbf16>
    %c0_1 = arith.constant 0 : index
    %c0_2 = arith.constant 0 : index
    %1 = vector.load %arg2[%c0_1, %c0_2] : memref<10x128xbf16, #tpu.memory_space<vmem>>, vector<10x128xbf16>
    %cst = arith.constant dense<0.000000e+00> : vector<8x128xf32>
    %2 = tpu.matmul %0, %1, %cst {dimension_numbers = #tpu.dot_dimension_numbers<[1], [0], [0], [1], [0, 0, 1, 1], [], []>} : vector<8x10xbf16>, vector<10x128xbf16>, vector<8x128xf32> -> vector<8x128xf32>
    %c0_3 = arith.constant 0 : index
    %c0_4 = arith.constant 0 : index
    %3 = vector.load %arg3[%c0_3, %c0_4] : memref<1x128xf32, #tpu.memory_space<vmem>>, vector<1x128xf32>
    %4 = vector.broadcast %3 : vector<1x128xf32> to vector<8x128xf32>
    %5 = arith.addf %2, %4 : vector<8x128xf32>
    %cst_5 = arith.constant 0.000000e+00 : f32
    %6 = vector.broadcast %cst_5 : f32 to vector<8x128xf32>
    %7 = arith.maximumf %5, %6 : vector<8x128xf32>
    %8 = arith.truncf %7 : vector<8x128xf32> to vector<8x128xbf16>
    %c0_6 = arith.constant 0 : index
    %c0_7 = arith.constant 0 : index
    %9 = vector.load %arg4[%c0_6, %c0_7] : memref<128x128xbf16, #tpu.memory_space<vmem>>, vector<128x128xbf16>
    %cst_8 = arith.constant dense<0.000000e+00> : vector<8x128xf32>
    %10 = tpu.matmul %8, %9, %cst_8 {dimension_numbers = #tpu.dot_dimension_numbers<[1], [0], [0], [1], [0, 0, 1, 1], [], []>} : vector<8x128xbf16>, vector<128x128xbf16>, vector<8x128xf32> -> vector<8x128xf32>
    %c0_9 = arith.constant 0 : index
    %c0_10 = arith.constant 0 : index
    %11 = vector.load %arg5[%c0_9, %c0_10] : memref<1x128xf32, #tpu.memory_space<vmem>>, vector<1x128xf32>
    %12 = vector.broadcast %11 : vector<1x128xf32> to vector<8x128xf32>
    %13 = arith.addf %10, %12 : vector<8x128xf32>
    %cst_11 = arith.constant 0.000000e+00 : f32
    %14 = vector.broadcast %cst_11 : f32 to vector<8x128xf32>
    %15 = arith.maximumf %13, %14 : vector<8x128xf32>
    %16 = arith.truncf %15 : vector<8x128xf32> to vector<8x128xbf16>
    %c0_12 = arith.constant 0 : index
    %c0_13 = arith.constant 0 : index
    %17 = vector.load %arg6[%c0_12, %c0_13] : memref<128x2xbf16, #tpu.memory_space<vmem>>, vector<128x2xbf16>
    %cst_14 = arith.constant dense<0.000000e+00> : vector<8x2xf32>
    %18 = tpu.matmul %16, %17, %cst_14 {dimension_numbers = #tpu.dot_dimension_numbers<[1], [0], [0], [1], [0, 0, 1, 1], [], []>} : vector<8x128xbf16>, vector<128x2xbf16>, vector<8x2xf32> -> vector<8x2xf32>
    %c0_15 = arith.constant 0 : index
    %c0_16 = arith.constant 0 : index
    %19 = vector.load %arg7[%c0_15, %c0_16] : memref<1x2xf32, #tpu.memory_space<vmem>>, vector<1x2xf32>
    %20 = vector.broadcast %19 : vector<1x2xf32> to vector<8x2xf32>
    %21 = arith.addf %18, %20 : vector<8x2xf32>
    %c0_17 = arith.constant 0 : index
    %c0_18 = arith.constant 0 : index
    %22 = vector.load %arg8[%c0_17, %c0_18] : memref<8x2xf32, #tpu.memory_space<vmem>>, vector<8x2xf32>
    tpu.vector_store %arg8[%c0_17, %c0_18], %21 {strides = array<i32>} : memref<8x2xf32, #tpu.memory_space<vmem>>, vector<8x2xf32>,
    return
  }
  func.func @transform_0(%arg0: i32) -> (i32, i32) {
    %c0_i32 = arith.constant 0 : i32
    %c0_i32_0 = arith.constant 0 : i32
    return %arg0, %c0_i32 : i32, i32
  }
  func.func @transform_1(%arg0: i32) -> (i32, i32) {
    %c0_i32 = arith.constant 0 : i32
    %c0_i32_0 = arith.constant 0 : i32
    %c0_i32_1 = arith.constant 0 : i32
    return %c0_i32, %c0_i32_0 : i32, i32
  }
  func.func @transform_2(%arg0: i32) -> (i32, i32) {
    %c0_i32 = arith.constant 0 : i32
    %c0_i32_0 = arith.constant 0 : i32
    %c0_i32_1 = arith.constant 0 : i32
    return %c0_i32, %c0_i32_0 : i32, i32
  }
  func.func @transform_3(%arg0: i32) -> (i32, i32) {
    %c0_i32 = arith.constant 0 : i32
    %c0_i32_0 = arith.constant 0 : i32
    %c0_i32_1 = arith.constant 0 : i32
    return %c0_i32, %c0_i32_0 : i32, i32
  }
  func.func @transform_4(%arg0: i32) -> (i32, i32) {
    %c0_i32 = arith.constant 0 : i32
    %c0_i32_0 = arith.constant 0 : i32
    %c0_i32_1 = arith.constant 0 : i32
    return %c0_i32, %c0_i32_0 : i32, i32
  }
  func.func @transform_5(%arg0: i32) -> (i32, i32) {
    %c0_i32 = arith.constant 0 : i32
    %c0_i32_0 = arith.constant 0 : i32
    %c0_i32_1 = arith.constant 0 : i32
    return %c0_i32, %c0_i32_0 : i32, i32
  }
  func.func @transform_6(%arg0: i32) -> (i32, i32) {
    %c0_i32 = arith.constant 0 : i32
    %c0_i32_0 = arith.constant 0 : i32
    %c0_i32_1 = arith.constant 0 : i32
    return %c0_i32, %c0_i32_0 : i32, i32
  }
  func.func @transform_7(%arg0: i32) -> (i32, i32) {
    %c0_i32 = arith.constant 0 : i32
    %c0_i32_0 = arith.constant 0 : i32
    return %arg0, %c0_i32 : i32, i32
  }
}

</mosaic_0001>

<bundles_post_ra>
// kernel: tpu_custom_call.1
= control target key start
LH: loop header
LB: loop body
LE: loop exit
PB: predicated region body
PF: predicated region fallthrough
CT: control target
= control target key end

     0   :  { %12 = vsyncpa [#allocation3], 0  ;;  %s466_s24 = smov [#allocation2]   ;;  %s607_s0 = inlined_call_operand.vmem [shape: bf16[8,10], index: 0, kind: input, shape index: {}]   ;;  %s608_s1 = inlined_call_operand.vmem [shape: bf16[10,128], index: 1, kind: input, shape index: {}]   ;;  %s609_s2 = inlined_call_operand.hbm [shape: f32[1,128], index: 2, kind: input, shape index: {}]   ;;  %s610_s3 = inlined_call_operand.vmem [shape: bf16[128,128], index: 3, kind: input, shape index: {}]   ;;  %s611_s4 = inlined_call_operand.vmem [shape: f32[1,128], index: 4, kind: input, shape index: {}]   ;;  %s612_s5 = inlined_call_operand.vmem [shape: bf16[128,2], index: 5, kind: input, shape index: {}]   ;;  %s613_s6 = inlined_call_operand.vmem [shape: f32[1,2], index: 6, kind: input, shape index: {}]   ;;  %s614_s7 = inlined_call_operand.vmem [shape: f32[8,2], index: 7, kind: output, shape index: {}]  }
   0x1   :  { %s23_s25 = sshll.u32 %s466_s24, 4  ;;  %s442_s28 = scalar_lea.hbm %s609_s2, 16  ;;  %s24_s25 = int_to_ptr.vmem [resolvable:$true] %s23_s25 }
   0x2   :  { %p443_p0 = scmp.ne.s32.totalorder %s609_s2, %s442_s28  ;;  %p446_p1 = scmp.lt.u32.totalorder %s442_s28, %s609_s2 }
   0x4   :  { %p448_p2 = pnand %p446_p1, %p443_p0 }
   0x6   :  { %451 = shalt.err (!%p448_p2)
}
   0x7   :  { %s452_s10 = scalar_lea.vmem %s24_s25, 16  ;;  %s456_s11 = scalar_lea.vmem %s24_s25, 32 }
   0x8   :  { %p453_p3 = scmp.ne.s32.totalorder %s24_s25, %s452_s10  ;;  %p457_p4 = scmp.lt.s32.totalorder %s24_s25, %s24_s25 }
   0x9   :  { %p458_p5 = scmp.lt.s32.totalorder %s456_s11, %s452_s10 }
   0xb   :  { %p459_p6 = por %p458_p5, %p457_p4 }
   0xd   :  { %p460_p7 = pnand %p459_p6, %p453_p3 }
   0xf   :  { %463 = shalt.err (!%p460_p7)
}
  0x10   :  { %26 = dma.hbm_to_vmem [thread:$0]  %s609_s2, 16, %s24_s25, [#allocation3]  }
  0x11   :  { %464 = dma.done.wait [#allocation3], 16  }
  0x12   :  { %465 = vsyncadd [#allocation3], 4294967280  ;;  %v467_v0 = vmov 0.0   ;;  %vm468_vm0 = vmmov 0   ;;  %vm58_vm1 = vcmask 1044480   ;;  %vm54_vm2 = vcmask 80896  }
  0x13   :  { %376 = vmatprep.subr.bf16.mxu0 %v467_v0  ;;  %378 = vmatprep.mubr.msk.bf16.mxu0 %vm468_vm0, %v467_v0  ;;  %v425_v1 = vld [vmem:[%s608_s1] sm:$0x1f]   ;;  %v427_v5 = vld [vmem:[%s610_s3 + $0x8] sm:$0xff]   ;;  %v428_v6 = vld [vmem:[%s610_s3 + $0x10] sm:$0xff]   ;;  %vm328_vm3 = vcmask 15360  }
  0x14   :  { %382 = vmatprep.subr.bf16.mxu1 %v467_v0  ;;  %398 = vmatprep.mubr.msk.bf16.mxu1 %vm468_vm0, %v467_v0  ;;  %v60_v2 = vsel %vm58_vm1, %v425_v1, 0  ;;  %v426_v3 = vld [vmem:[%s610_s3] sm:$0xff]   ;;  %v429_v7 = vld [vmem:[%s610_s3 + $0x18] sm:$0xff]   ;;  %v431_v9 = vld [vmem:[%s610_s3 + $0x28] sm:$0xff]  }
  0x15   :  { %377 = vmatpush3.bf16.msra.mxu0 %v60_v2  ;;  %v39_v4 = vld [vmem:[%s607_s0] sm:$0xf]  ;;  %383 = vmatpush3.bf16.msra.mxu1 %v426_v3  ;;  %v432_v10 = vld [vmem:[%s610_s3 + $0x30] sm:$0xff]   ;;  %v433_v11 = vld [vmem:[%s610_s3 + $0x38] sm:$0xff]  }
  0x16   :  { %402 = vmatprep.subr.bf16.mxu0 %v467_v0  ;;  %384 = vmatprep.subr.bf16.mxu1 %v467_v0  ;;  %v430_v8 = vld [vmem:[%s610_s3 + $0x20] sm:$0xff]   ;;  %v435_v13 = vld [vmem:[%s612_s5 + $0x8] sm:$0xff]   ;;  %v436_v14 = vld [vmem:[%s612_s5 + $0x10] sm:$0xff]  }
  0x17   :  { %v434_v12 = vld [vmem:[%s612_s5] sm:$0xff]   ;;  %v437_v15 = vld [vmem:[%s612_s5 + $0x18] sm:$0xff]   ;;  %v439_v17 = vld [vmem:[%s612_s5 + $0x28] sm:$0xff]  }
  0x18   :  { %379 = vmatmul.mubr.msk.bf16.vlgmr.msra.gmra.mrb[0].mxu0 %vm54_vm2, %v39_v4  ;;  %v438_v16 = vld [vmem:[%s612_s5 + $0x20] sm:$0xff]   ;;  %v440_v26 = vld [vmem:[%s612_s5 + $0x30] sm:$0xff]   ;;  %v441_v27 = vld [vmem:[%s612_s5 + $0x38] sm:$0xff]  }
  0x19   :  { %418 = vmatprep.mubr.msk.bf16.mxu0 %vm468_vm0, %v467_v0  ;;  %385 = vmatpush3.bf16.msra.mxu1 %v427_v5  ;;  %v335_v18 = vld [vmem:[#allocation2] ss:$0 sm:$0xff] }
  0x1a   :  { %386 = vmatprep.subr.bf16.mxu1 %v467_v0  ;;  %403 = vmatpush3.bf16.msra.mxu0 %v434_v12  ;;  %v338_v28 = vld [vmem:[%s611_s4] ss:$0 sm:$0xff] }
  0x1b   :  { %404 = vmatprep.subr.bf16.mxu0 %v467_v0  ;;  %v347_v36 = vld [vmem:[%s613_s6] ss:$0 sm:$0xff] }
  0x1d   :  { %387 = vmatpush3.bf16.msra.mxu1 %v428_v6 }
  0x1e   :  { %388 = vmatprep.subr.bf16.mxu1 %v467_v0  ;;  %405 = vmatpush3.bf16.msra.mxu0 %v435_v13 }
  0x1f   :  { %406 = vmatprep.subr.bf16.mxu0 %v467_v0 }
  0x21   :  { %389 = vmatpush3.bf16.msra.mxu1 %v429_v7 }
  0x22   :  { %390 = vmatprep.subr.bf16.mxu1 %v467_v0  ;;  %407 = vmatpush3.bf16.msra.mxu0 %v436_v14 }
  0x23   :  { %408 = vmatprep.subr.bf16.mxu0 %v467_v0 }
  0x25   :  { %391 = vmatpush3.bf16.msra.mxu1 %v430_v8 }
  0x26   :  { %392 = vmatprep.subr.bf16.mxu1 %v467_v0  ;;  %409 = vmatpush3.bf16.msra.mxu0 %v437_v15 }
  0x27   :  { %410 = vmatprep.subr.bf16.mxu0 %v467_v0 }
  0x29   :  { %393 = vmatpush3.bf16.msra.mxu1 %v431_v9 }
  0x2a   :  { %394 = vmatprep.subr.bf16.mxu1 %v467_v0  ;;  %411 = vmatpush3.bf16.msra.mxu0 %v438_v16 }
  0x2b   :  { %412 = vmatprep.subr.bf16.mxu0 %v467_v0 }
  0x2d   :  { %395 = vmatpush3.bf16.msra.mxu1 %v432_v10 }
  0x2e   :  { %396 = vmatprep.subr.bf16.mxu1 %v467_v0  ;;  %413 = vmatpush3.bf16.msra.mxu0 %v439_v17 }
  0x2f   :  { %414 = vmatprep.subr.bf16.mxu0 %v467_v0 }
  0x31   :  { %397 = vmatpush3.bf16.msra.mxu1 %v433_v11 }
  0x32   :  { %415 = vmatpush3.bf16.msra.mxu0 %v440_v26 }
  0x33   :  { %416 = vmatprep.subr.bf16.mxu0 %v467_v0 }
  0x36   :  { %417 = vmatpush3.bf16.msra.mxu0 %v441_v27 }
  0xeb   :  { %v96_v19 = vpop.f32.mrb[0].mxu0 }
  0xec   :  { %v97_v20 = vadd.f32 %v335_v18, %v96_v19  ;;  %v380_v21 = vpop.f32.mrb[1].mxu0 }
  0xed   :  { %v99_v22 = vpop.f32.mrb[2].mxu0 }
  0xee   :  { %v102_v23 = vmax.f32 %v97_v20, 0.0  ;;  %v381_v24 = vpop.f32.mrb[3].mxu0 }
  0xf0   :  { %v103_v25 = vpack.c.bf16 %v102_v23, %v102_v23 }
  0xf2   :  { %399 = vmatmul.mubr.bf16.vlgmr.msra.gmra.mrb[0].mxu1 %v103_v25 }
 0x1c5   :  { %v209_v29 = vpop.f32.mrb[0].mxu1 }
 0x1c6   :  { %v210_v30 = vadd.f32 %v338_v28, %v209_v29  ;;  %v400_v31 = vpop.f32.mrb[1].mxu1 }
 0x1c7   :  { %v212_v32 = vpop.f32.mrb[2].mxu1 }
 0x1c8   :  { %v215_v33 = vmax.f32 %v210_v30, 0.0  ;;  %v401_v34 = vpop.f32.mrb[3].mxu1 }
 0x1ca   :  { %v216_v35 = vpack.c.bf16 %v215_v33, %v215_v33 }
 0x1cc   :  { %419 = vmatmul.mubr.bf16.vlgmr.msra.gmra.mrb[4].mxu0 %v216_v35 }
 0x29f   :  { %v322_v37 = vpop.f32.mrb[4].mxu0 }
 0x2a0   :  { %v323_v38 = vadd.f32 %v347_v36, %v322_v37  ;;  %v420_v39 = vpop.f32.mrb[5].mxu0 }
 0x2a1   :  { %v325_v40 = vpop.f32.mrb[6].mxu0 }
 0x2a2   :  { %329 = vst.msk [vmem:[%s614_s7] sm:$0xff] %vm328_vm3, %v323_v38  ;;  %v421_v41 = vpop.f32.mrb[7].mxu0 }
 0x2a3   :  { %334 = vsyncpa [#allocation3], 1 }

</bundles_post_ra>
